<compile_context>
chip_gen: v6e
topology: v6e:2x2x1
jax: 0.10.0
libtpu: 0.0.40
codegen_flags: <defaults>
</compile_context>

<pallas_src>
import jax
import jax.numpy as jnp
from jax import lax
from jax.experimental import pallas as pl
from jax.experimental.pallas import tpu as pltpu

IN_FEATURES = 20 * 20   # 400
OUT_FEATURES = 32


def _linear_kernel(x_ref, w_ref, b_ref, o_ref):
    # x_ref: (1, 400) f32
    # w_ref: (32, 400) f32  (torch-native (out, in) layout, lane-dense)
    # b_ref: (1, 32)  f32
    # o_ref: (1, 32)  f32
    # y[m, n] = sum_k x[m, k] * w[n, k]  ==  x @ W.T   (MXU, f32 accumulate)
    o_ref[...] = (
        lax.dot_general(
            x_ref[...],
            w_ref[...],
            dimension_numbers=(((1,), (1,)), ((), ())),
            preferred_element_type=jnp.float32,
        )
        + b_ref[...]
    )


@jax.jit
def mynn_forward(x, w, b2d):
    """Forward pass of MyNN: x.float().view(1, -1) -> Flatten -> Linear(400, 32)."""
    # Glue (fused by jit): cast + flatten. Params are already kernel-ready.
    x_flat = x.astype(jnp.float32).reshape(1, IN_FEATURES)
    return pl.pallas_call(
        _linear_kernel,
        out_shape=jax.ShapeDtypeStruct((1, OUT_FEATURES), jnp.float32),
        # No grid: whole (small) arrays live in VMEM; memory_space-only specs
        # avoid any (8,128) block_shape divisibility pitfalls.
        in_specs=[
            pl.BlockSpec(memory_space=pltpu.MemorySpace.VMEM),
            pl.BlockSpec(memory_space=pltpu.MemorySpace.VMEM),
            pl.BlockSpec(memory_space=pltpu.MemorySpace.VMEM),
        ],
        out_specs=pl.BlockSpec(memory_space=pltpu.MemorySpace.VMEM),
    )(x_flat, w, b2d)


def init_params(key):
    """Init matching nn.Linear(400, 32) defaults (uniform +/- 1/sqrt(in_features)).

    Parameters are stored exactly as the kernel consumes them:
      * weight in torch-native (out, in) = (32, 400) f32 layout (lane-dense on TPU)
      * bias pre-reshaped to (1, 32) f32
    so that mynn_forward performs no per-call casts/reshapes on the params.
    """
    kw, kb = jax.random.split(key)
    bound = 1.0 / jnp.sqrt(jnp.float32(IN_FEATURES))
    w = jax.random.uniform(
        kw, (OUT_FEATURES, IN_FEATURES), jnp.float32, minval=-bound, maxval=bound
    )
    b2d = jax.random.uniform(
        kb, (1, OUT_FEATURES), jnp.float32, minval=-bound, maxval=bound
    )
    return w, b2d


if __name__ == "__main__":
    # Example input consistent with the forward: 400 elements total -> (20, 20).
    key = jax.random.PRNGKey(0)
    x = jax.random.normal(key, (20, 20), jnp.float32)

    # NOTE: the original __init__ contains `[nn.Linear() for i in range(n)]`,
    # which is a no-op (and would raise in torch); intentionally ignored.
    w, b2d = init_params(jax.random.PRNGKey(42))

    logits = mynn_forward(x, w, b2d)
    jax.block_until_ready(logits)

    # Reference check against plain JAX (same math: x @ W.T + b).
    ref = x.astype(jnp.float32).reshape(1, -1) @ w.T + b2d
    assert logits.shape == (1, OUT_FEATURES), logits.shape
    assert jnp.allclose(logits, ref, atol=1e-4, rtol=1e-4), (
        float(jnp.max(jnp.abs(logits - ref)))
    )

    print("KERNEL_OK")
</pallas_src>

<mosaic_0001>
module attributes {stable_mosaic.version = 11 : i64} {
  func.func @_linear_kernel(%arg0: memref<1x400xf32, #tpu.memory_space<vmem>>, %arg1: memref<32x400xf32, #tpu.memory_space<vmem>>, %arg2: memref<1x32xf32, #tpu.memory_space<vmem>>, %arg3: memref<1x32xf32, #tpu.memory_space<vmem>>) attributes {dimension_semantics = [], scalar_prefetch = 0 : i64, scratch_operands = 0 : i64, tpu.core_type = #tpu.core_type<tc>} {
    %c0 = arith.constant 0 : index
    %c0_0 = arith.constant 0 : index
    %0 = vector.load %arg0[%c0, %c0_0] : memref<1x400xf32, #tpu.memory_space<vmem>>, vector<1x400xf32>
    %c0_1 = arith.constant 0 : index
    %c0_2 = arith.constant 0 : index
    %1 = vector.load %arg1[%c0_1, %c0_2] : memref<32x400xf32, #tpu.memory_space<vmem>>, vector<32x400xf32>
    %cst = arith.constant dense<0.000000e+00> : vector<1x32xf32>
    %2 = tpu.matmul %0, %1, %cst {dimension_numbers = #tpu.dot_dimension_numbers<[1], [1], [0], [0], [0, 0, 1, 0], [], []>} : vector<1x400xf32>, vector<32x400xf32>, vector<1x32xf32> -> vector<1x32xf32>
    %c0_3 = arith.constant 0 : index
    %c0_4 = arith.constant 0 : index
    %3 = vector.load %arg2[%c0_3, %c0_4] : memref<1x32xf32, #tpu.memory_space<vmem>>, vector<1x32xf32>
    %4 = arith.addf %2, %3 : vector<1x32xf32>
    %c0_5 = arith.constant 0 : index
    %c0_6 = arith.constant 0 : index
    %5 = vector.load %arg3[%c0_5, %c0_6] : memref<1x32xf32, #tpu.memory_space<vmem>>, vector<1x32xf32>
    tpu.vector_store %arg3[%c0_5, %c0_6], %4 {strides = array<i32>} : memref<1x32xf32, #tpu.memory_space<vmem>>, vector<1x32xf32>,
    return
  }
}

</mosaic_0001>

<bundles_post_ra>
// kernel: mynn_forward.1
= control target key start
LH: loop header
LB: loop body
LE: loop exit
PB: predicated region body
PF: predicated region fallthrough
CT: control target
= control target key end

     0   :  { %8 = vsyncpa [#allocation3], 0  ;;  %s333_s0 = inlined_call_operand.vmem [shape: f32[1,400], index: 0, kind: input, shape index: {}]   ;;  %s334_s1 = inlined_call_operand.hbm [shape: f32[32,400], index: 1, kind: input, shape index: {}]   ;;  %s335_s2 = inlined_call_operand.vmem [shape: f32[1,32], index: 2, kind: input, shape index: {}]   ;;  %s336_s3 = inlined_call_operand.hbm [shape: f32[1,32], index: 3, kind: output, shape index: {}]  }
   0x1   :  { %9 = vsyncpa [#allocation4], 0  ;;  %s292_s12 = smov [#allocation2]  }
   0x2   :  { %s17_s13 = sshll.u32 %s292_s12, 4  ;;  %s18_s13 = int_to_ptr.vmem [resolvable:$true] %s17_s13 }
   0x3   :  { %s256_s14 = scalar_lea.vmem %s18_s13, 2048  ;;  %p261_p1 = scmp.lt.s32.totalorder %s18_s13, %s18_s13 }
   0x4   :  { %p257_p0 = scmp.ne.s32.totalorder %s18_s13, %s256_s14  ;;  %p262_p2 = scmp.lt.s32.totalorder %s256_s14, %s256_s14 }
   0x6   :  { %p263_p3 = por %p262_p2, %p261_p1 }
   0x8   :  { %p264_p4 = pnand %p263_p3, %p257_p0 }
   0xa   :  { %267 = shalt.err (!%p264_p4)
}
   0xb   :  { %s293_s15 = smov 512   ;;  %s294_s16 = smov 32  }
   0xc   :  { %23 = dma.hbm_to_vmem [thread:$0]  %s334_s1, 2048, %s18_s13, [#allocation3], %s293_s15, %s293_s15, %s294_s16  }
   0xd   :  { %288 = dma.done.wait [#allocation3], 2048  }
   0xe   :  { %289 = vsyncadd [#allocation3], 4294965248  ;;  %v48_v0 = vlaneseq  ;;  %vm67_vm0 = vcmask 130048   ;;  %v43_v2 = vld [vmem:[#allocation2 + $0x68] sm:$0xff]  ;;  %v45_v3 = vld [vmem:[#allocation2 + $0x78] sm:$0xff]  ;;  %s295_s21 = smov [#allocation5]  }
   0xf   :  { %v42_v4 = vld [vmem:[#allocation2 + $0x60] sm:$0xff]  ;;  %106 = vmatprep.subr.mxu0 %v43_v2  ;;  %239 = vmatprep.subr.msk.mxu1 %vm67_vm0, %v45_v3  ;;  %v44_v5 = vld [vmem:[#allocation2 + $0x70] sm:$0xff]  ;;  %v39_v6 = vld [vmem:[#allocation2 + $0x48] sm:$0xff]  ;;  %s230_s22 = sshll.u32 %s295_s21, 4  ;;  %vm222_vm1 = vcmask 253952   ;;  %s231_s22 = int_to_ptr.vmem [resolvable:$true] %s230_s22 }
  0x10   :  { %v49_v1 = vshrl.u32 %v48_v0, 7  ;;  %v41_v7 = vld [vmem:[#allocation2 + $0x58] sm:$0xff]  ;;  %107 = vmatpush1.xpose.msra.mxu0 %v42_v4  ;;  %177 = vmatpush1.xpose.msra.mxu1 %v44_v5  ;;  %v38_v10 = vld [vmem:[#allocation2 + $0x40] sm:$0xff]  ;;  %v40_v11 = vld [vmem:[#allocation2 + $0x50] sm:$0xff]  ;;  %s268_s23 = scalar_lea.vmem %s231_s22, 16  ;;  %s272_s24 = scalar_lea.vmem %s231_s22, 32 }
  0x11   :  { %108 = vmatprep.subr.mxu0 %v39_v6  ;;  %240 = vmatprep.subr.msk.mxu1 %vm67_vm0, %v41_v7  ;;  %v35_v12 = vld [vmem:[#allocation2 + $0x28] sm:$0xff]  ;;  %v37_v13 = vld [vmem:[#allocation2 + $0x38] sm:$0xff]  ;;  %v29_v14 = vld [vmem:[%s333_s0] sm:$0xf]  ;;  %p269_p5 = scmp.ne.s32.totalorder %s231_s22, %s268_s23  ;;  %p273_p6 = scmp.lt.s32.totalorder %s231_s22, %s231_s22 }
  0x12   :  { %v54_v8 = vsub.s32 1, %v49_v1  ;;  %v62_v9 = vsub.s32 3, %v49_v1  ;;  %v34_v17 = vld [vmem:[#allocation2 + $0x20] sm:$0xff]  ;;  %v36_v18 = vld [vmem:[#allocation2 + $0x30] sm:$0xff]  ;;  %v31_v19 = vld [vmem:[#allocation2 + $0x8] sm:$0xff]  ;;  %v50_v21 = vsub.s32 0, %v49_v1  ;;  %p274_p7 = scmp.lt.s32.totalorder %s272_s24, %s268_s23 }
  0x13   :  { %v33_v20 = vld [vmem:[#allocation2 + $0x18] sm:$0xff]  ;;  %v58_v22 = vsub.s32 2, %v49_v1  ;;  %v30_v23 = vld [vmem:[#allocation2] sm:$0xff]  ;;  %v32_v24 = vld [vmem:[#allocation2 + $0x10] sm:$0xff] }
  0x14   :  { %109 = vmatpush1.xpose.msra.mxu0 %v38_v10  ;;  %179 = vmatpush1.xpose.msra.mxu1 %v40_v11  ;;  %v55_v15 = vrot.slane %v29_v14, %v54_v8  ;;  %v63_v16 = vrot.slane %v29_v14, %v62_v9  ;;  %v51_v25 = vrot.slane %v29_v14, %v50_v21  ;;  %v46_v27 = vld [vmem:[%s335_s2] sm:$0x1]  ;;  %p275_p8 = por %p274_p7, %p273_p6 }
  0x15   :  { %110 = vmatprep.subr.mxu0 %v35_v12  ;;  %241 = vmatprep.subr.msk.mxu1 %vm67_vm0, %v37_v13  ;;  %v59_v26 = vrot.slane %v29_v14, %v58_v22 }
  0x16   :  { %146 = vmatprep.mubr.f32.mxu0 %v55_v15  ;;  %243 = vmatprep.mubr.msk.f32.mxu1 %vm67_vm0, %v63_v16  ;;  %p276_p9 = pnand %p275_p8, %p269_p5 }
  0x18   :  { %111 = vmatpush1.xpose.msra.mxu0 %v34_v17  ;;  %181 = vmatpush1.xpose.msra.mxu1 %v36_v18 }
  0x19   :  { %112 = vmatprep.subr.mxu0 %v31_v19  ;;  %242 = vmatprep.subr.msk.mxu1 %vm67_vm0, %v33_v20 }
  0x1c   :  { %113 = vmatpush1.xpose.msra.mxu0 %v30_v23  ;;  %183 = vmatpush1.xpose.msra.mxu1 %v32_v24 }
  0x1f   :  { %147 = vmatmul.mubr.f32.vlgmr.msra.gmra.mxu0 %v51_v25  ;;  %217 = vmatmul.mubr.f32.vlgmr.msra.gmra.mxu1 %v59_v26 }
  0xdf   :  { %v148_v28 = vpop.f32.mrf.mxu0  ;;  %v218_v29 = vpop.f32.mrf.mxu1 }
  0xe0   :  { %v149_v30 = vadd.f32 %v148_v28, %v46_v27 }
  0xe1   :  { %v150_v31 = vpop.f32.mrf.mxu0  ;;  %v220_v32 = vpop.f32.mrf.mxu1 }
  0xe2   :  { %v219_v33 = vadd.f32 %v218_v29, %v149_v30 }
  0xe4   :  { %223 = vst.msk [vmem:[#allocation5] sm:$0x1] %vm222_vm1, %v219_v33 }
  0xe5   :  { %279 = shalt.err (!%p276_p9)
}
  0xe6   :  { %233 = dma.vmem_to_hbm [thread:$0]  %s231_s22, 16, %s336_s3, [#allocation4]  }
  0xe7   :  { %290 = dma.done.wait [#allocation4], 16  }
  0xe8   :  { %291 = vsyncadd [#allocation4], 4294967280 }
  0xe9   :  { %237 = vsyncpa [#allocation3], 1 }
  0xea   :  { %238 = vsyncpa [#allocation4], 1 }

</bundles_post_ra>
